<compile_context>
chip_gen: v6e
topology: v6e:2x2x1
jax: 0.10.0
libtpu: 0.0.40
codegen_flags: <defaults>
</compile_context>

<pallas_src>
import functools

import jax
import jax.numpy as jnp
from jax.experimental import pallas as pl
from jax.experimental.pallas import tpu as pltpu


def _pow(x, p):
    if p == 2:
        return x * x
    if p == 1:
        return x
    # TODO(synk): fractional p on negative activations follows jnp power semantics (NaN).
    return x ** p


def _mean_rows(xp, inv_c):
    """mean over the (channel) sublane axis of a (C, TN) f32 tile.

    Wide C -> MXU ones-row reduction (vector-extended slot, free when the
    kernel is DMA-bound); narrow C -> a single XLU sum.
    """
    c = xp.shape[0]
    if c >= 16:
        ones_row = jnp.full((1, c), inv_c, jnp.float32)
        return jnp.dot(ones_row, xp, preferred_element_type=jnp.float32)   # (1, TN)
    return jnp.sum(xp, axis=0, keepdims=True) * inv_c


def _kd_loss_kernel(w_ref, b_ref, ft_ref, fs_ref, out_ref, *,
                    p, inv_cout, inv_cs, tn, ntg, n_total, needs_mask):
    """Grid = (B, G, NT/G).  out_ref is a per-(b,g) (1,1,1,TN) partial-sum block,
    resident across the inner spatial axis."""
    k = pl.program_id(2)

    @pl.when(k == 0)
    def _init():
        out_ref[...] = jnp.zeros_like(out_ref)

    ft = ft_ref[0]                        # (Ct, TN) native dtype -> straight into the MXU
    fs = fs_ref[0].astype(jnp.float32)    # (Cs, TN)

    # ---- teacher: Conv1d(kernel_size=1) channel mix on the MXU (f32 accumulate),
    #      then at() = mean(.^p, channel).
    red = jnp.dot(w_ref[...], ft, preferred_element_type=jnp.float32) + b_ref[...]  # (Cout, TN)
    at_t = _mean_rows(_pow(red, p), inv_cout)                                        # (1, TN)

    # ---- student: at() = mean(.^p, channel)
    at_s = _mean_rows(_pow(fs, p), inv_cs)                                           # (1, TN)

    diff = at_s - at_t
    sq = diff * diff                                                                  # (1, TN)

    if needs_mask:
        # Last spatial block is partially out of bounds: mask padded columns
        # (bias makes at_t nonzero there while at_s is zero / garbage).
        block_n = pl.program_id(1) * ntg + k
        col = block_n * tn + jax.lax.broadcasted_iota(jnp.int32, (1, tn), 1)
        sq = jnp.where(col < n_total, sq, 0.0)

    out_ref[...] = out_ref[...] + sq.reshape(out_ref.shape)


def _vmem_capacity_bytes():
    try:
        return int(pltpu.get_tpu_info().vmem_capacity_bytes)
    except Exception:
        return 64 << 20   # conservative fallback: assume v7x's smaller per-core VMEM


def _choose_tn(n, c_t, c_s, c_out, ft_bytes, fs_bytes, budget_bytes, max_tn):
    """Pick the spatial tile TN (multiple of 128).

    The per-step footprint counts the double-buffered ft/fs input blocks PLUS
    the f32 intermediates (red, red^p, fs^p, at rows) so the chosen TN stays
    inside the scoped-VMEM budget even on v7x's 64 MiB.
    """
    max_tn = max(128, (max_tn // 128) * 128)
    per_col = (2 * (c_t * ft_bytes + c_s * fs_bytes)     # double-buffered input blocks
               + (c_out + c_s + 6) * 4)                   # f32 intermediates per step
    cap = max(128, (budget_bytes // per_col) // 128 * 128)
    n_pad = ((n + 127) // 128) * 128
    cap = max(128, min(cap, max_tn, n_pad))
    if n % 128 == 0:
        tn = cap
        while n % tn != 0:        # terminates: 128 always divides n here
            tn -= 128
    else:
        tn = cap                  # ragged: keep lane-dense TN, mask the tail in-kernel
    return tn, (n % tn != 0)


def kd_loss(f_t, f_s, weight, bias, p=2, max_tn=32768):
    """Equivalent of KDLoss(p, in_channel, out_channel).forward(f_t, f_s, norm=False)."""
    # TODO(synk): norm=True branch (F.normalize of the attention maps) not implemented.
    B, Ct = f_t.shape[0], f_t.shape[1]
    Cs = f_s.shape[1]
    ft = f_t.reshape(B, Ct, -1)
    fs = f_s.reshape(B, Cs, -1)
    N = ft.shape[-1]
    assert fs.shape[-1] == N, "teacher/student spatial sizes must match"
    Cout = weight.shape[0]

    # --- generation-aware VMEM sizing --------------------------------------
    vmem_cap = _vmem_capacity_bytes()
    budget = (26 << 20) if vmem_cap <= (80 << 20) else (56 << 20)
    vmem_limit = int(min(budget + (16 << 20), vmem_cap))

    ft_bytes = jnp.dtype(ft.dtype).itemsize
    fs_bytes = jnp.dtype(fs.dtype).itemsize
    TN, needs_mask = _choose_tn(N, Ct, Cs, Cout, ft_bytes, fs_bytes, budget, max_tn)
    NT = -(-N // TN)

    # v7x megacore: when B == 1, split the spatial axis into a parallel group
    # axis so the second TensorCore has work.  Harmless on v5e/v6e (single TC).
    G = 2 if (B == 1 and NT >= 2 and NT % 2 == 0) else 1
    NTG = NT // G

    # Feed the MXU natively: keep bf16 inputs bf16 (weight cast to match).
    w_dtype = ft.dtype if jnp.dtype(ft.dtype) == jnp.dtype(jnp.bfloat16) else jnp.float32
    w_arg = weight.astype(w_dtype)
    b_arg = bias.astype(jnp.float32).reshape(Cout, 1)

    kernel = functools.partial(
        _kd_loss_kernel, p=p, inv_cout=1.0 / Cout, inv_cs=1.0 / Cs,
        tn=TN, ntg=NTG, n_total=N, needs_mask=needs_mask)

    # Advisory cost: this kernel is bandwidth-dominated.
    flops = (2.0 * B * N * Cout * Ct          # channel-mix matmul
             + 2.0 * B * N * (Cout + Cs)      # channel-mean reductions
             + B * N * (Cout + Cs + 3))       # powers / diff / square
    bytes_accessed = (B * N * (Ct * ft_bytes + Cs * fs_bytes)
                      + B * G * TN * 4 + weight.size * 4 + bias.size * 4)
    cost = pl.CostEstimate(flops=int(flops), transcendentals=0,
                           bytes_accessed=int(bytes_accessed))

    partials = pl.pallas_call(
        kernel,
        out_shape=jax.ShapeDtypeStruct((B, G, 1, TN), jnp.float32),
        grid_spec=pltpu.PrefetchScalarGridSpec(
            num_scalar_prefetch=0,
            grid=(B, G, NTG),
            in_specs=[
                pl.BlockSpec((Cout, Ct), lambda b, g, k: (0, 0)),            # conv1d weight
                pl.BlockSpec((Cout, 1), lambda b, g, k: (0, 0)),             # conv1d bias
                pl.BlockSpec((1, Ct, TN), lambda b, g, k: (b, 0, g * NTG + k)),  # f_t tile
                pl.BlockSpec((1, Cs, TN), lambda b, g, k: (b, 0, g * NTG + k)),  # f_s tile
            ],
            out_specs=pl.BlockSpec((1, 1, 1, TN), lambda b, g, k: (b, g, 0, 0)),
        ),
        compiler_params=pltpu.CompilerParams(
            dimension_semantics=("parallel", "parallel", "arbitrary"),
            vmem_limit_bytes=vmem_limit,
        ),
        cost_estimate=cost,
    )(w_arg, b_arg, ft, fs)

    return jnp.sum(partials) / float(B * N)


def _reference(f_t, f_s, weight, bias, p=2):
    """Pure-JAX reference mirroring the PyTorch module (norm=False)."""
    B, Ct = f_t.shape[0], f_t.shape[1]
    Cs = f_s.shape[1]
    ft = f_t.reshape(B, Ct, -1).astype(jnp.float32)
    fs = f_s.reshape(B, Cs, -1).astype(jnp.float32)
    ft_red = jnp.einsum("oc,bcn->bon", weight, ft) + bias[None, :, None]
    at_t = jnp.mean(ft_red ** p, axis=1)
    at_s = jnp.mean(fs ** p, axis=1)
    return jnp.mean((at_s - at_t) ** 2)


if __name__ == "__main__":
    p = 2
    key = jax.random.PRNGKey(0)

    def run_case(key, name, B, c_in, c_out, H, W, dtype=jnp.float32,
                 max_tn=32768, rtol=1e-4, atol=1e-5):
        k_ft, k_fs, k_w, k_b, key = jax.random.split(key, 5)
        f_t = jax.random.normal(k_ft, (B, c_in, H, W), dtype=jnp.float32).astype(dtype)
        f_s = jax.random.normal(k_fs, (B, c_out, H, W), dtype=jnp.float32).astype(dtype)
        weight = 0.1 * jax.random.normal(k_w, (c_out, c_in), dtype=jnp.float32)
        bias = 0.1 * jax.random.normal(k_b, (c_out,), dtype=jnp.float32)

        loss = jax.block_until_ready(kd_loss(f_t, f_s, weight, bias, p=p, max_tn=max_tn))
        ref = _reference(f_t, f_s, weight, bias, p=p)
        assert jnp.allclose(loss, ref, rtol=rtol, atol=atol), (name, loss, ref)
        return key

    # 1. tiny channels (8 -> 4): channel mix now also on the MXU
    key = run_case(key, "tiny-channels", 2, 8, 4, 16, 16)
    # 2. large channels (192 -> 96): MXU mix + MXU ones-row channel means
    key = run_case(key, "large-channels", 2, 192, 96, 16, 16)
    # 3. bf16 activations fed natively to the MXU (no f32 upcast pass)
    key = run_case(key, "bf16-native", 2, 8, 4, 16, 16,
                   dtype=jnp.bfloat16, rtol=5e-2, atol=5e-3)
    # 4. multi-step spatial accumulation (NT > 1, resident accumulator)
    key = run_case(key, "multi-step", 2, 8, 4, 32, 32, max_tn=256)
    # 5. B == 1 megacore spatial split (G = 2 parallel groups)
    key = run_case(key, "b1-megacore-split", 1, 8, 4, 32, 32, max_tn=512)
    # 6. ragged spatial size (N = 180, masked boundary tile)
    key = run_case(key, "ragged-masked-tail", 2, 8, 4, 12, 15, max_tn=128)

    print("KERNEL_OK")
</pallas_src>

<mosaic_0001>
module attributes {stable_mosaic.version = 11 : i64} {
  func.func @_kd_loss_kernel(%arg0: i32, %arg1: i32, %arg2: i32, %arg3: memref<4x8xf32, #tpu.memory_space<vmem>>, %arg4: memref<4x1xf32, #tpu.memory_space<vmem>>, %arg5: memref<1x8x256xf32, #tpu.memory_space<vmem>>, %arg6: memref<1x4x256xf32, #tpu.memory_space<vmem>>, %arg7: memref<1x1x1x256xf32, #tpu.memory_space<vmem>>) attributes {dimension_semantics = [#tpu.dimension_semantics<parallel>, #tpu.dimension_semantics<parallel>, #tpu.dimension_semantics<arbitrary>], iteration_bounds = array<i64: 2, 1, 1>, scalar_prefetch = 0 : i64, scratch_operands = 0 : i64, tpu.core_type = #tpu.core_type<tc>, window_params = [{pipeline_mode = #tpu.pipeline_mode<synchronous>, transform_indices = @transform_0, window_bounds = array<i64: 4, 8>}, {pipeline_mode = #tpu.pipeline_mode<synchronous>, transform_indices = @transform_1, window_bounds = array<i64: 4, 1>}, {transform_indices = @transform_2, window_bounds = array<i64: 1, 8, 256>}, {transform_indices = @transform_3, window_bounds = array<i64: 1, 4, 256>}, {transform_indices = @transform_4, window_bounds = array<i64: 1, 1, 1, 256>}]} {
    %c0_i32 = arith.constant 0 : i32
    %0 = arith.cmpi eq, %arg2, %c0_i32 : i32
    %1 = arith.extui %0 : i1 to i32
    %c0_i32_0 = arith.constant 0 : i32
    %2 = arith.cmpi ne, %1, %c0_i32_0 : i32
    scf.if %2 {
      %cst_22 = arith.constant 0.000000e+00 : f32
      %28 = vector.broadcast %cst_22 : f32 to vector<1x1x1x256xf32>
      %c0_23 = arith.constant 0 : index
      %c0_24 = arith.constant 0 : index
      %c0_25 = arith.constant 0 : index
      %c0_26 = arith.constant 0 : index
      %29 = vector.load %arg7[%c0_23, %c0_24, %c0_25, %c0_26] : memref<1x1x1x256xf32, #tpu.memory_space<vmem>>, vector<1x1x1x256xf32>
      tpu.vector_store %arg7[%c0_23, %c0_24, %c0_25, %c0_26], %28 {strides = array<i32>} : memref<1x1x1x256xf32, #tpu.memory_space<vmem>>, vector<1x1x1x256xf32>,
    } else {
    }
    %c0 = arith.constant 0 : index
    %c0_1 = arith.constant 0 : index
    %c0_2 = arith.constant 0 : index
    %3 = vector.load %arg5[%c0, %c0_1, %c0_2] : memref<1x8x256xf32, #tpu.memory_space<vmem>>, vector<1x8x256xf32>
    %4 = vector.shape_cast %3 : vector<1x8x256xf32> to vector<8x256xf32>
    %c0_3 = arith.constant 0 : index
    %c0_4 = arith.constant 0 : index
    %c0_5 = arith.constant 0 : index
    %5 = vector.load %arg6[%c0_3, %c0_4, %c0_5] : memref<1x4x256xf32, #tpu.memory_space<vmem>>, vector<1x4x256xf32>
    %6 = vector.shape_cast %5 : vector<1x4x256xf32> to vector<4x256xf32>
    %c0_6 = arith.constant 0 : index
    %c0_7 = arith.constant 0 : index
    %7 = vector.load %arg3[%c0_6, %c0_7] : memref<4x8xf32, #tpu.memory_space<vmem>>, vector<4x8xf32>
    %cst = arith.constant dense<0.000000e+00> : vector<4x256xf32>
    %8 = tpu.matmul %7, %4, %cst {dimension_numbers = #tpu.dot_dimension_numbers<[1], [0], [0], [1], [0, 0, 1, 1], [], []>} : vector<4x8xf32>, vector<8x256xf32>, vector<4x256xf32> -> vector<4x256xf32>
    %c0_8 = arith.constant 0 : index
    %c0_9 = arith.constant 0 : index
    %9 = vector.load %arg4[%c0_8, %c0_9] : memref<4x1xf32, #tpu.memory_space<vmem>>, vector<4x1xf32>
    %10 = vector.broadcast %9 : vector<4x1xf32> to vector<4x256xf32>
    %11 = arith.addf %8, %10 : vector<4x256xf32>
    %12 = arith.mulf %11, %11 : vector<4x256xf32>
    %cst_10 = arith.constant dense<0.000000e+00> : vector<256xf32>
    %13 = vector.multi_reduction <add>, %12, %cst_10 [0] : vector<4x256xf32> to vector<256xf32>
    %14 = vector.shape_cast %13 : vector<256xf32> to vector<1x256xf32>
    %cst_11 = arith.constant 2.500000e-01 : f32
    %15 = vector.broadcast %cst_11 : f32 to vector<1x256xf32>
    %16 = arith.mulf %14, %15 : vector<1x256xf32>
    %17 = arith.mulf %6, %6 : vector<4x256xf32>
    %cst_12 = arith.constant dense<0.000000e+00> : vector<256xf32>
    %18 = vector.multi_reduction <add>, %17, %cst_12 [0] : vector<4x256xf32> to vector<256xf32>
    %19 = vector.shape_cast %18 : vector<256xf32> to vector<1x256xf32>
    %cst_13 = arith.constant 2.500000e-01 : f32
    %20 = vector.broadcast %cst_13 : f32 to vector<1x256xf32>
    %21 = arith.mulf %19, %20 : vector<1x256xf32>
    %22 = arith.subf %21, %16 : vector<1x256xf32>
    %23 = arith.mulf %22, %22 : vector<1x256xf32>
    %c0_14 = arith.constant 0 : index
    %c0_15 = arith.constant 0 : index
    %c0_16 = arith.constant 0 : index
    %c0_17 = arith.constant 0 : index
    %24 = vector.load %arg7[%c0_14, %c0_15, %c0_16, %c0_17] : memref<1x1x1x256xf32, #tpu.memory_space<vmem>>, vector<1x1x1x256xf32>
    %25 = vector.shape_cast %23 : vector<1x256xf32> to vector<1x1x1x256xf32>
    %26 = arith.addf %24, %25 : vector<1x1x1x256xf32>
    %c0_18 = arith.constant 0 : index
    %c0_19 = arith.constant 0 : index
    %c0_20 = arith.constant 0 : index
    %c0_21 = arith.constant 0 : index
    %27 = vector.load %arg7[%c0_18, %c0_19, %c0_20, %c0_21] : memref<1x1x1x256xf32, #tpu.memory_space<vmem>>, vector<1x1x1x256xf32>
    tpu.vector_store %arg7[%c0_18, %c0_19, %c0_20, %c0_21], %26 {strides = array<i32>} : memref<1x1x1x256xf32, #tpu.memory_space<vmem>>, vector<1x1x1x256xf32>,
    return
  }
  func.func @transform_0(%arg0: i32, %arg1: i32, %arg2: i32) -> (i32, i32) {
    %c0_i32 = arith.constant 0 : i32
    %c0_i32_0 = arith.constant 0 : i32
    %c0_i32_1 = arith.constant 0 : i32
    return %c0_i32, %c0_i32_0 : i32, i32
  }
  func.func @transform_1(%arg0: i32, %arg1: i32, %arg2: i32) -> (i32, i32) {
    %c0_i32 = arith.constant 0 : i32
    %c0_i32_0 = arith.constant 0 : i32
    %c0_i32_1 = arith.constant 0 : i32
    return %c0_i32, %c0_i32_0 : i32, i32
  }
  func.func @transform_2(%arg0: i32, %arg1: i32, %arg2: i32) -> (i32, i32, i32) {
    %c1_i32 = arith.constant 1 : i32
    %0 = arith.muli %arg1, %c1_i32 : i32
    %1 = arith.addi %0, %arg2 : i32
    %c0_i32 = arith.constant 0 : i32
    %c0_i32_0 = arith.constant 0 : i32
    return %arg0, %c0_i32, %1 : i32, i32, i32
  }
  func.func @transform_3(%arg0: i32, %arg1: i32, %arg2: i32) -> (i32, i32, i32) {
    %c1_i32 = arith.constant 1 : i32
    %0 = arith.muli %arg1, %c1_i32 : i32
    %1 = arith.addi %0, %arg2 : i32
    %c0_i32 = arith.constant 0 : i32
    %c0_i32_0 = arith.constant 0 : i32
    return %arg0, %c0_i32, %1 : i32, i32, i32
  }
  func.func @transform_4(%arg0: i32, %arg1: i32, %arg2: i32) -> (i32, i32, i32, i32) {
    %c0_i32 = arith.constant 0 : i32
    %c0_i32_0 = arith.constant 0 : i32
    %c0_i32_1 = arith.constant 0 : i32
    return %arg0, %arg1, %c0_i32, %c0_i32_0 : i32, i32, i32, i32
  }
}

</mosaic_0001>

<bundles_post_ra>
// kernel: tpu_custom_call.1
= control target key start
LH: loop header
LB: loop body
LE: loop exit
PB: predicated region body
PF: predicated region fallthrough
CT: control target
= control target key end

     0   :  { %9 = vsyncpa [#allocation3], 0  ;;  %s1041_s0 = inlined_call_operand.vmem [shape: f32[4,8], index: 0, kind: input, shape index: {}]   ;;  %s1042_s1 = inlined_call_operand.vmem [shape: f32[4,1], index: 1, kind: input, shape index: {}]   ;;  %s1043_s2 = inlined_call_operand.hbm [shape: f32[2,8,256], index: 2, kind: input, shape index: {}]   ;;  %s1044_s3 = inlined_call_operand.hbm [shape: f32[2,4,256], index: 3, kind: input, shape index: {}]   ;;  %s1045_s4 = inlined_call_operand.hbm [shape: f32[2,1,1,256], index: 4, kind: output, shape index: {}]  }
   0x1   :  { %11 = vsyncpa [#allocation3 + $0x1], 0 }
   0x2   :  { %12 = vsyncpa [#allocation6], 0 }
   0x3   :  { %14 = vsyncpa [#allocation6 + $0x1], 0 }
   0x4   :  { %15 = vsyncpa [#allocation4], 0 }
   0x5   :  { %17 = vsyncpa [#allocation4 + $0x1], 0  ;;  %s852_s15 = smov 0   ;;  %s854_s16 = smov 0  }
   0x6   :  { %s856_s17 = smov 0   ;;  %s858_s18 = smov 0  }
   0x7   :  { %s860_s19 = smov 0   ;;  %s862_s20 = smov 0  }
   0x8 LB: > { %s585_s21 = sadd.s32 4294967295, %s819_s20   ;;  %s586_s22 = sadd.s32 4294967294, %s819_s20   ;;  %s819_s20 = sphi %s862_s20, %s23_s20   ;;  %s815_s19 = sphi %s860_s19, %s1059_s19   ;;  %s811_s18 = sphi %s858_s18, %s1058_s18   ;;  %s807_s17 = sphi %s856_s17, %s1057_s17   ;;  %s803_s16 = sphi %s854_s16, %s1056_s16   ;;  %s799_s15 = sphi %s852_s15, %s1055_s15  }
   0x9   : > { %s42_s23 = sadd.s32 1, %s815_s19  ;;  %s95_s24 = sadd.s32 1, %s807_s17 }
   0xa   : > { %p44_p0 = scmp.ge.s32.totalorder %s42_s23, 2  ;;  %p102_p1 = scmp.ne.s32.totalorder %s807_s17, %s803_s16 }
   0xb   : > { %p103_p2 = scmp.eq.s32.totalorder %s819_s20, 0  ;;  %p108_p3 = scmp.ne.s32.totalorder %s803_s16, %s799_s15 }
   0xc   : > { %s1061_s23 = smov (%p44_p0, %s42_s23), 0  ;;  %p109_p5 = scmp.eq.s32.totalorder %s585_s21, 0 }
   0xd   : > { %p893_p4 = por %p103_p2, %p102_p1  ;;  %s90_s26 = ssub.s32 %s815_s19, %s1061_s23 }
   0xe   : > { %p164_p6 = scmp.eq.s32.totalorder %s585_s21, 1  ;;  %p93_p7 = scmp.eq.s32.totalorder %s90_s26, 0 }
   0xf   : > { %p899_p8 = por %p109_p5, %p108_p3  ;;  %p170_p10 = scmp.eq.s32.totalorder %s586_s22, 1 }
  0x10   : > { %p903_p9 = por %p164_p6, %p102_p1  ;;  %p625_p13 = scmp.lt.s32.totalorder %s819_s20, 2 }
  0x11   : > { %s908_s29 = scalar_select %p93_p7, %s807_s17, %s95_s24  }
  0x12   : > { %p910_p11 = por %p170_p10, %p108_p3  ;;  %s917_s5 = sand.u32 1, %s807_s17  }
  0x13   : > { %s589_s6 = sshll.u32 %s917_s5, 4  ;;  %s605_s7 = sshll.u32 %s815_s19, 8 }
  0x14   : > { %s209_s10 = scalar_lea.hbm %s1043_s2, %s605_s7  ;;  %s200_s11 = scalar_lea.vmem [#allocation2], %s589_s6 }
  0x15   : > { %s211_s12 = sshll.u32 %s200_s11, 4  ;;  %p926_p0 = pnand %p625_p13, %p893_p4  ;;  %s212_s12 = int_to_ptr.vmem [resolvable:$true] %s211_s12 }
  0x16   : > { %p595_p1 = scmp.ge.s32.totalorder %s819_s20, 1  ;;  %p238_p2 = scmp.lt.s32.totalorder %s819_s20, 3 }
  0x17   : > { %s197_s14 = scalar_lea.sflag [#allocation3], %s917_s5  ;;  %p681_p3 = pneg %p926_p0 }
  0x18   : > { %s692_s21 = scalar_lea.vmem %s212_s12, 256  ;;  %s821_s22 = smov [#allocation2]  }
  0x19   : > { %p693_p5 = scmp.ne.s32.totalorder %s212_s12, %s692_s21  ;;  %s697_s24 = sshll.u32 %s821_s22, 4  ;;  %s698_s24 = int_to_ptr.vmem [resolvable:$false] %s697_s24 }
  0x1a   : > { %s699_s25 = scalar_lea.vmem %s698_s24, 512  ;;  %p700_p4 = scmp.lt.s32.totalorder %s212_s12, %s698_s24 }
  0x1b   : > { %p695_p6 = pnand %p693_p5, %p681_p3  ;;  %p701_p10 = scmp.lt.s32.totalorder %s699_s25, %s692_s21 }
  0x1d   : > { %p696_p7 = pneg %p695_p6  ;;  %p702_p13 = por %p701_p10, %p700_p4 }
  0x1f   : > { %p703_p12 = pnand %p702_p13, %p696_p7 }
  0x21   : > { %706 = shalt.err (!%p703_p12)
}
  0x22   : > { %617 = dma.hbm_to_vmem [thread:$0]  (!%p926_p0), %s209_s10, 256, %s212_s12, %s197_s14  }
  0x23   : > { %p944_p5 = pnand %p595_p1, %p238_p2  ;;  %s592_s6 = sshll.u32 %s917_s5, 3 }
  0x24   : > { %s606_s7 = sshll.u32 %s815_s19, 7  ;;  %s222_s21 = scalar_lea.vmem [#allocation5], %s592_s6 }
  0x25   : > { %s231_s11 = scalar_lea.hbm %s1044_s3, %s606_s7  ;;  %s233_s22 = sshll.u32 %s222_s21, 4  ;;  %s234_s22 = int_to_ptr.vmem [resolvable:$true] %s233_s22 }
  0x26   : > { %s219_s24 = scalar_lea.sflag [#allocation6], %s917_s5  ;;  %s720_s25 = scalar_lea.vmem %s234_s22, 128 }
  0x27   : > { %p721_p12 = scmp.ne.s32.totalorder %s234_s22, %s720_s25  ;;  %s822_s10 = smov [#allocation5]  }
  0x28   : > { %s725_s12 = sshll.u32 %s822_s10, 4  ;;  %s726_s12 = int_to_ptr.vmem [resolvable:$false] %s725_s12 }
  0x29   : > { %p723_p6 = pnand %p721_p12, %p681_p3  ;;  %s727_s14 = scalar_lea.vmem %s726_s12, 256 }
  0x2a   : > { %p728_p1 = scmp.lt.s32.totalorder %s234_s22, %s726_s12  ;;  %p729_p2 = scmp.lt.s32.totalorder %s727_s14, %s720_s25 }
  0x2b   : > { %p724_p7 = pneg %p723_p6 }
  0x2c   : > { %p730_p4 = por %p729_p2, %p728_p1 }
  0x2e   : > { %p731_p10 = pnand %p730_p4, %p724_p7 }
  0x30   : > { %734 = shalt.err (!%p731_p10)
}
  0x31   : > { %620 = dma.hbm_to_vmem [thread:$0]  (!%p926_p0), %s231_s11, 128, %s234_s22, %s219_s24  }
  0x32   : > { %242 = sbr.rel (%p944_p5) target bundleno = 302 (0x12e), region = 36  ;;  %s962_s5 = sand.u32 (!%p944_p5), 1, %s803_s16  }
  0x33   : > { %s596_s6 = sshll.u32 (!%p944_p5), %s962_s5, 4  ;;  %s245_s7 = scalar_lea.sflag (!%p944_p5), [#allocation3], %s962_s5 }
  0x34   : > { %s248_s8 = scalar_lea.vmem (!%p944_p5), [#allocation2], %s596_s6 }
  0x37   : > { %786 = dma.done.wait (%p899_p8), %s245_s7, 256  }
  0x38   : > { %788 = vsyncadd (%p899_p8), %s245_s7, 4294967040  ;;  %s597_s13 = sshll.u32 %s962_s5, 3  ;;  %s254_s26 = scalar_lea.sflag [#allocation6], %s962_s5 }
  0x39   : > { %s257_s9 = scalar_lea.vmem [#allocation5], %s597_s13 }
  0x3a   : > { %790 = dma.done.wait (%p899_p8), %s254_s26, 128  }
  0x3b   : > { %792 = vsyncadd (%p899_p8), %s254_s26, 4294967168  ;;  %s598_s11 = sshll.u32 %s962_s5, 1  ;;  %v295_v0 = vlaneseq  ;;  %v823_v1 = vmov 0.0   ;;  %v824_v3 = vmov 0   ;;  %v301_v4 = vld [vmem:[%s248_s8 + $0x8] sm:$0xff]  ;;  %v300_v5 = vld [vmem:[%s248_s8] sm:$0xff] }
  0x3c   : > { %378 = vmatprep.mubr.f32.mxu0 %v823_v1  ;;  %678 = vset.pattern.permute.xlu0 %v824_v3  ;;  %s981_s21 = scalar_lea.vmem [#allocation7], %s598_s11  ;;  %v303_v6 = vld [vmem:[%s1041_s0] sm:$0xf]  ;;  %vm310_vm1 = vcmask 64512   ;;  %vm387_vm2 = vcmask 1043456   ;;  %s607_s10 = sshll.u32 %s811_s18, 5 }
  0x3d   : > { %vm977_vm0 = vcmp.lt.s32.totalorder %v295_v0, 256  ;;  %344 = vmatprep.subr.mxu0 %v301_v4  ;;  %v304_v7 = vld [vmem:[%s1042_s1] sm:$0xf]  ;;  %v825_v43 = vmov 1966171168   ;;  %v436_v52 = vshrl.u32 %v295_v0, 7  ;;  %s468_s7 = scalar_lea.hbm %s1045_s4, %s607_s10 }
  0x3e   : > { %299 = vst.msk [vmem:[%s981_s21] sm:$0x3] %vm977_vm0, %v823_v1  ;;  %345 = vmatpush1.msra.mxu0 %v300_v5  ;;  %307 = vperm.xlu0 %678, %v304_v7   ;;  %v302_v8 = vld [vmem:[%s257_s9] sm:$0xff]  ;;  %v433_v44 = vunpack.c.l.s4 %v825_v43  ;;  %s470_s12 = sshll.u32 %s981_s21, 4  ;;  %s454_s8 = scalar_lea.sflag [#allocation4], %s962_s5  ;;  %s471_s12 = int_to_ptr.vmem [resolvable:$true] %s470_s12 }
  0x3f   : > { %599 = vmatmul.mubr.msk.f32.vlgmr.msra.gmra.mxu0 %vm310_vm1, %v303_v6  ;;  %v404_v9 = vmul.f32 %v302_v8, %v302_v8  ;;  %s735_s13 = scalar_lea.vmem %s471_s12, 32  ;;  %s826_s26 = smov [#allocation7]  }
  0x40   : > { %v434_v51 = vunpack.c.0.s8 %v433_v44  ;;  %p736_p8 = scmp.ne.s32.totalorder %s471_s12, %s735_s13  ;;  %s739_s9 = sshll.u32 %s826_s26, 4  ;;  %s740_s9 = int_to_ptr.vmem [resolvable:$false] %s739_s9 }
  0x41   : > { %v406_v10 = vcombine.high %v404_v9, %v404_v9  ;;  %v408_v11 = vsel %vm387_vm2, %v404_v9, 0.0  ;;  %s741_s18 = scalar_lea.vmem %s740_s9, 64  ;;  %p742_p13 = scmp.lt.s32.totalorder %s471_s12, %s740_s9 }
  0x42   : > { %v409_v13 = vrot.slane %v408_v11, 4  ;;  %v437_v56 = vsub.s32 %v434_v51, %v436_v52  ;;  %p737_p0 = pnand %p736_p8, %p903_p9  ;;  %p743_p5 = scmp.lt.s32.totalorder %s741_s18, %s735_s13 }
  0x43   : > { %v415_v12 = vsel %vm387_vm2, %v406_v10, 0.0 }
  0x44   : > { %v416_v14 = vrot.slane %v415_v12, 4  ;;  %v410_v15 = vadd.f32 %v409_v13, %v408_v11  ;;  %p738_p3 = pneg %p737_p0  ;;  %p744_p12 = por %p743_p5, %p742_p13 }
  0x45   : > { %v428_v61 = vld [vmem:[%s981_s21] sm:$0x3] }
  0x46   : > { %v417_v17 = vadd.f32 %v416_v14, %v415_v12  ;;  %v411_v19 = vrot.slane %v410_v15, 2  ;;  %p745_p6 = pnand %p744_p12, %p738_p3 }
  0x48   : > { %v418_v21 = vrot.slane %v417_v17, 2  ;;  %v412_v25 = vadd.f32 %v411_v19, %v410_v15 }
  0x4a   : > { %v419_v29 = vadd.f32 %v418_v21, %v417_v17  ;;  %v413_v32 = vrot.slane %v412_v25, 1 }
  0x4c   : > { %v420_v36 = vrot.slane %v419_v29, 1  ;;  %v414_v38 = vadd.f32 %v413_v32, %v412_v25 }
  0x4e   : > { %v421_v42 = vadd.f32 %v420_v36, %v419_v29  ;;  %v422_v46 = vmul.f32 0.25, %v414_v38 }
  0x50   : > { %v423_v50 = vmul.f32 0.25, %v421_v42 }
  0xb9   : > { %v308_v16 = vpop.permute.xlu0 %307 }
  0xff   : > { %v380_v18 = vpop.f32.mrf.mxu0 }
 0x100   : > { %v381_v20 = vadd.f32 %v380_v18, %v308_v16 }
 0x101   : > { %v382_v22 = vpop.f32.mrf.mxu0 }
 0x102   : > { %v385_v23 = vmul.f32 %v381_v20, %v381_v20  ;;  %v383_v24 = vadd.f32 %v382_v22, %v308_v16 }
 0x104   : > { %v388_v26 = vsel %vm387_vm2, %v385_v23, 0.0  ;;  %v386_v27 = vmul.f32 %v383_v24, %v383_v24 }
 0x105   : > { %v389_v28 = vrot.slane %v388_v26, 4 }
 0x106   : > { %v395_v30 = vsel %vm387_vm2, %v386_v27, 0.0 }
 0x107   : > { %v390_v31 = vadd.f32 %v389_v28, %v388_v26  ;;  %v396_v33 = vrot.slane %v395_v30, 4 }
 0x109   : > { %v391_v34 = vrot.slane %v390_v31, 2  ;;  %v397_v35 = vadd.f32 %v396_v33, %v395_v30 }
 0x10b   : > { %v392_v37 = vadd.f32 %v391_v34, %v390_v31  ;;  %v398_v39 = vrot.slane %v397_v35, 2 }
 0x10d   : > { %v393_v40 = vrot.slane %v392_v37, 1  ;;  %v399_v41 = vadd.f32 %v398_v39, %v397_v35 }
 0x10f   : > { %v394_v45 = vadd.f32 %v393_v40, %v392_v37  ;;  %v400_v47 = vrot.slane %v399_v41, 1 }
 0x111   : > { %v402_v48 = vmul.f32 0.25, %v394_v45  ;;  %v401_v49 = vadd.f32 %v400_v47, %v399_v41 }
 0x113   : > { %v424_v53 = vsub.f32 %v422_v46, %v402_v48  ;;  %v403_v54 = vmul.f32 0.25, %v401_v49 }
 0x115   : > { %v425_v55 = vsub.f32 %v423_v50, %v403_v54  ;;  %v426_v57 = vmul.f32 %v424_v53, %v424_v53 }
 0x117   : > { %v427_v58 = vmul.f32 %v425_v55, %v425_v55 }
 0x119   : > { %v431_v59 = vcombine.low %v426_v57, %v427_v58 }
 0x11b   : > { %v438_v60 = vrot.slane %v431_v59, %v437_v56 }
 0x11d   : > { %v445_v62 = vrot.slane %v438_v60, %v437_v56 }
 0x11f   : > { %v447_v63 = vadd.f32 %v445_v62, %v428_v61 }
 0x121   : > { %452 = vst.msk [vmem:[%s981_s21] sm:$0x3] %vm977_vm0, %v447_v63 }
 0x122   : > { %748 = shalt.err (!%p745_p6)
}
 0x123   : > { %s749_s11 = scalar_lea.hbm %s468_s7, 32  ;;  %s753_s27 = scalar_lea.hbm %s1045_s4, 64 }
 0x124   : > { %p750_p7 = scmp.ne.s32.totalorder %s468_s7, %s749_s11  ;;  %p754_p4 = scmp.lt.s32.totalorder %s468_s7, %s1045_s4 }
 0x125   : > { %p755_p10 = scmp.lt.s32.totalorder %s753_s27, %s749_s11 }
 0x126   : > { %p751_p1 = pnand %p750_p7, %p903_p9 }
 0x127   : > { %p756_p8 = por %p755_p10, %p754_p4 }
 0x128   : > { %p752_p2 = pneg %p751_p1 }
 0x12a   : > { %p757_p0 = pnand %p756_p8, %p752_p2 }
 0x12c   : > { %760 = shalt.err (!%p757_p0)
}
 0x12d   : > { %612 = dma.vmem_to_hbm [thread:$0]  (%p903_p9), %s471_s12, 32, %s468_s7, %s454_s8  }
 0x12e PF: > { %s482_s25 = sand.u32 1, %s799_s15   ;;  %p1054_p3 = scmp.ge.s32.totalorder %s819_s20, 2 }
 0x12f   : > { %s483_s10 = scalar_lea.sflag [#allocation4], %s482_s25 }
 0x130   : > { %p622_p13 = pnand %p1054_p3, %p910_p11 }
 0x132   : > { %p623_p5 = pneg %p622_p13 }
 0x134   : > { %794 = dma.done.wait (%p623_p5), %s483_s10, 32  }
 0x135   : > { %796 = vsyncadd (%p623_p5), %s483_s10, 4294967264  ;;  %s23_s20 = sadd.s32 1, %s819_s20   ;;  %s1055_s15 = smov %s803_s16 }
 0x136   : > { %p20_p12 = scmp.ge.s32.totalorder %s23_s20, 4   ;;  %s1056_s16 = smov %s807_s17 }
 0x137   : > { %s1057_s17 = smov %s908_s29  ;;  %s1058_s18 = smov %s815_s19 }
 0x138   : > { %s1059_s19 = smov %s1061_s23  ;;  %22 = sbr.rel (!%p20_p12) target bundleno = 8 (0x8), region = 98 }
 0x13d   :  { %488 = vsyncpa [#allocation3], 1 }
 0x13e   :  { %490 = vsyncpa [#allocation3 + $0x1], 1 }
 0x13f   :  { %491 = vsyncpa [#allocation6], 1 }
 0x140   :  { %493 = vsyncpa [#allocation6 + $0x1], 1 }
 0x141   :  { %494 = vsyncpa [#allocation4], 1 }
 0x142   :  { %496 = vsyncpa [#allocation4 + $0x1], 1 }

</bundles_post_ra>
